<compile_context>
chip_gen: v5e
topology: v5e:2x2
jax: 0.10.0
libtpu: 0.0.40
codegen_flags: <defaults>
</compile_context>

<pallas_src>
import jax
import jax.numpy as jnp
from jax.experimental import pallas as pl
from jax.experimental.pallas import tpu as pltpu


def _threshold_linear_kernel(thr_ref, x_ref, w_ref, o_ref):
    # thr_ref: SMEM scalar-prefetch (1,) f32 threshold.
    # x_ref: (tm, tk), w_ref: (tk, tn), o_ref: (tm, tn) f32 (resident across k).
    k = pl.program_id(2)

    @pl.when(k == 0)
    def _():
        o_ref[...] = jnp.zeros_like(o_ref)

    threshold = thr_ref[0]
    w = w_ref[...]
    # VPU mask (|w| > threshold keeps strict-> matches torch), then MXU matmul
    # accumulated directly into the resident f32 output block.
    w_masked = w * (jnp.abs(w) > threshold)
    o_ref[...] += jnp.dot(x_ref[...], w_masked, preferred_element_type=jnp.float32)


def _round_up(v, m):
    return ((v + m - 1) // m) * m


def _largest_divisor_tile(dim_padded, align, cap):
    """Largest multiple of `align` that is <= cap and divides dim_padded."""
    best = align
    t = align
    while t <= cap:
        if dim_padded % t == 0:
            best = t
        t += align
    return best


def threshold_linear_forward(x, weight, threshold, *, tm_cap=None, tn_cap=None, tk_cap=None):
    """x: (M, K) f32, weight: (K, N) f32, threshold scalar -> (M, N) f32."""
    M, K = x.shape
    Kw, N = weight.shape
    assert K == Kw, "in_channels mismatch"

    # Shape-aware default caps.  Small-batch (GEMV-like) calls are HBM-bound on
    # the weight stream -> favor very wide tk/tn tiles; otherwise balanced
    # MXU-friendly tiles.  Worst-case double-buffered VMEM footprint:
    #   2 * 4B * (tm*tk + tk*tn + tm*tn)  ~= 18 MiB (GEMV caps) / 10.5 MiB (big caps),
    # comfortably under the 48 MiB limit we request below (safe on v5e/v6e/v7x).
    if tm_cap is None or tn_cap is None or tk_cap is None:
        if M <= 64:
            d_tm, d_tn, d_tk = 64, 2048, 1024
        else:
            d_tm, d_tn, d_tk = 512, 1024, 512
        tm_cap = tm_cap if tm_cap is not None else d_tm
        tn_cap = tn_cap if tn_cap is not None else d_tn
        tk_cap = tk_cap if tk_cap is not None else d_tk

    # K tile: full-extent block for narrow K (no zero-padding / wasted MXU
    # passes), otherwise a 128-aligned divisor tile of the padded extent.
    if K <= tk_cap:
        tk, Kp = K, K
    else:
        Kp = _round_up(K, 128)
        tk = _largest_divisor_tile(Kp, 128, tk_cap)

    # M tile: full-extent for small M (block == array dim is always legal),
    # otherwise 8-aligned divisor tile.
    if M <= tm_cap:
        tm, Mp = M, M
    else:
        Mp = _round_up(M, 8)
        tm = _largest_divisor_tile(Mp, 8, tm_cap)

    # N tile: full-extent for small N, else 128-aligned divisor tile.  If the M
    # axis collapses to a single block, split N into >=2 lane-dense blocks so
    # both v7x TensorCores get a "parallel" block.
    if N <= tn_cap:
        tn, Np = N, N
        if Mp == tm and N >= 256:
            tn = _round_up(-(-N // 2), 128)
            Np = _round_up(N, tn)
    else:
        Np = _round_up(N, 128)
        tn = _largest_divisor_tile(Np, 128, tn_cap)

    x_p = x if (Mp == M and Kp == K) else jnp.pad(x, ((0, Mp - M), (0, Kp - K)))
    w_p = weight if (Kp == K and Np == N) else jnp.pad(weight, ((0, Kp - K), (0, Np - N)))

    thr = jnp.asarray([threshold], dtype=jnp.float32)

    grid = (Mp // tm, Np // tn, Kp // tk)

    out = pl.pallas_call(
        _threshold_linear_kernel,
        out_shape=jax.ShapeDtypeStruct((Mp, Np), jnp.float32),
        grid_spec=pltpu.PrefetchScalarGridSpec(
            num_scalar_prefetch=1,
            grid=grid,
            in_specs=[
                pl.BlockSpec((tm, tk), lambda i, j, k, thr: (i, k)),
                pl.BlockSpec((tk, tn), lambda i, j, k, thr: (k, j)),
            ],
            out_specs=pl.BlockSpec((tm, tn), lambda i, j, k, thr: (i, j)),
        ),
        compiler_params=pltpu.CompilerParams(
            dimension_semantics=("parallel", "parallel", "arbitrary"),
            vmem_limit_bytes=48 * 1024 * 1024,
        ),
    )(thr, x_p, w_p)

    if (Mp, Np) != (M, N):
        out = out[:M, :N]
    return out


class ThresholdLinear:
    """JAX/Pallas port of the PyTorch `threshold_linear` module."""

    def __init__(self, in_channels, out_channels, threshold, key):
        self.in_channels = in_channels
        self.out_channels = out_channels
        self.threshold = threshold
        self.scale = 1.0 / (in_channels * out_channels)
        # torch.rand -> uniform [0, 1); deterministic init from PRNGKey.
        self.weight = self.scale * jax.random.uniform(
            key, (in_channels, out_channels), dtype=jnp.float32
        )

    def __call__(self, x):
        return threshold_linear_forward(x, self.weight, self.threshold)


if __name__ == "__main__":
    key = jax.random.PRNGKey(0)
    k_w, k_x = jax.random.split(key)

    batch = 8
    in_channels = 32
    out_channels = 128
    # Threshold small enough that the mask keeps some weights
    # (weights are in [0, scale) with scale = 1/(32*128)).
    threshold = 0.5 / (in_channels * out_channels)

    module = ThresholdLinear(in_channels, out_channels, threshold, k_w)
    x = jax.random.normal(k_x, (batch, in_channels), dtype=jnp.float32)

    out = jax.block_until_ready(module(x))

    # Reference check in plain JAX (same semantics as the torch forward).
    w = module.weight
    ref = x @ (w * (jnp.abs(w) > threshold).astype(w.dtype))
    assert out.shape == (batch, out_channels)
    assert jnp.allclose(out, ref, atol=1e-5, rtol=1e-5)

    # Also exercise the multi-block / padded / accumulating path with tiny
    # forced tile caps (grid has several blocks on every axis).
    k_w2, k_x2 = jax.random.split(k_x)
    M2, K2, N2 = 50, 200, 200
    w2 = jax.random.uniform(k_w2, (K2, N2), dtype=jnp.float32) / (K2 * N2)
    x2 = jax.random.normal(k_x2, (M2, K2), dtype=jnp.float32)
    thr2 = 0.5 / (K2 * N2)
    out2 = jax.block_until_ready(
        threshold_linear_forward(x2, w2, thr2, tm_cap=16, tn_cap=128, tk_cap=128)
    )
    ref2 = x2 @ (w2 * (jnp.abs(w2) > thr2).astype(w2.dtype))
    assert jnp.allclose(out2, ref2, atol=1e-5, rtol=1e-5)

    print("KERNEL_OK")
</pallas_src>

<mosaic_0001>
module attributes {stable_mosaic.version = 11 : i64} {
  func.func @_threshold_linear_kernel(%arg0: i32, %arg1: i32, %arg2: i32, %arg3: memref<1xf32, #tpu.memory_space<smem>>, %arg4: memref<8x32xf32, #tpu.memory_space<vmem>>, %arg5: memref<32x128xf32, #tpu.memory_space<vmem>>, %arg6: memref<8x128xf32, #tpu.memory_space<vmem>>) attributes {dimension_semantics = [#tpu.dimension_semantics<parallel>, #tpu.dimension_semantics<parallel>, #tpu.dimension_semantics<arbitrary>], iteration_bounds = array<i64: 1, 1, 1>, scalar_prefetch = 1 : i64, scratch_operands = 0 : i64, tpu.core_type = #tpu.core_type<tc>, window_params = [{transform_indices = @transform_0, window_bounds = array<i64: 8, 32>}, {transform_indices = @transform_1, window_bounds = array<i64: 32, 128>}, {transform_indices = @transform_2, window_bounds = array<i64: 8, 128>}]} {
    %c0_i32 = arith.constant 0 : i32
    %0 = arith.cmpi eq, %arg2, %c0_i32 : i32
    %1 = arith.extui %0 : i1 to i32
    %c0_i32_0 = arith.constant 0 : i32
    %2 = arith.cmpi ne, %1, %c0_i32_0 : i32
    scf.if %2 {
      %cst_9 = arith.constant 0.000000e+00 : f32
      %16 = vector.broadcast %cst_9 : f32 to vector<8x128xf32>
      %c0_10 = arith.constant 0 : index
      %c0_11 = arith.constant 0 : index
      %17 = vector.load %arg6[%c0_10, %c0_11] : memref<8x128xf32, #tpu.memory_space<vmem>>, vector<8x128xf32>
      tpu.vector_store %arg6[%c0_10, %c0_11], %16 {strides = array<i32>} : memref<8x128xf32, #tpu.memory_space<vmem>>, vector<8x128xf32>,
    } else {
    }
    %c0 = arith.constant 0 : index
    %3 = memref.load %arg3[%c0] : memref<1xf32, #tpu.memory_space<smem>>
    %c0_1 = arith.constant 0 : index
    %c0_2 = arith.constant 0 : index
    %4 = vector.load %arg5[%c0_1, %c0_2] : memref<32x128xf32, #tpu.memory_space<vmem>>, vector<32x128xf32>
    %5 = math.absf %4 : vector<32x128xf32>
    %6 = vector.broadcast %3 : f32 to vector<32x128xf32>
    %7 = arith.cmpf ogt, %5, %6 : vector<32x128xf32>
    %8 = arith.extui %7 : vector<32x128xi1> to vector<32x128xi32>
    %9 = arith.sitofp %8 : vector<32x128xi32> to vector<32x128xf32>
    %10 = arith.mulf %4, %9 : vector<32x128xf32>
    %c0_3 = arith.constant 0 : index
    %c0_4 = arith.constant 0 : index
    %11 = vector.load %arg6[%c0_3, %c0_4] : memref<8x128xf32, #tpu.memory_space<vmem>>, vector<8x128xf32>
    %c0_5 = arith.constant 0 : index
    %c0_6 = arith.constant 0 : index
    %12 = vector.load %arg4[%c0_5, %c0_6] : memref<8x32xf32, #tpu.memory_space<vmem>>, vector<8x32xf32>
    %cst = arith.constant dense<0.000000e+00> : vector<8x128xf32>
    %13 = tpu.matmul %12, %10, %cst {dimension_numbers = #tpu.dot_dimension_numbers<[1], [0], [0], [1], [0, 0, 1, 1], [], []>} : vector<8x32xf32>, vector<32x128xf32>, vector<8x128xf32> -> vector<8x128xf32>
    %14 = arith.addf %11, %13 : vector<8x128xf32>
    %c0_7 = arith.constant 0 : index
    %c0_8 = arith.constant 0 : index
    %15 = vector.load %arg6[%c0_7, %c0_8] : memref<8x128xf32, #tpu.memory_space<vmem>>, vector<8x128xf32>
    tpu.vector_store %arg6[%c0_7, %c0_8], %14 {strides = array<i32>} : memref<8x128xf32, #tpu.memory_space<vmem>>, vector<8x128xf32>,
    return
  }
  func.func @transform_0(%arg0: i32, %arg1: i32, %arg2: i32, %arg3: memref<1xf32, #tpu.memory_space<smem>>) -> (i32, i32) {
    %c0_i32 = arith.constant 0 : i32
    return %arg0, %arg2 : i32, i32
  }
  func.func @transform_1(%arg0: i32, %arg1: i32, %arg2: i32, %arg3: memref<1xf32, #tpu.memory_space<smem>>) -> (i32, i32) {
    %c0_i32 = arith.constant 0 : i32
    return %arg2, %arg1 : i32, i32
  }
  func.func @transform_2(%arg0: i32, %arg1: i32, %arg2: i32, %arg3: memref<1xf32, #tpu.memory_space<smem>>) -> (i32, i32) {
    %c0_i32 = arith.constant 0 : i32
    return %arg0, %arg1 : i32, i32
  }
}

</mosaic_0001>

<bundles_post_ra>
// kernel: tpu_custom_call.1
= control target key start
LH: loop header
LB: loop body
LE: loop exit
PB: predicated region body
PF: predicated region fallthrough
CT: control target
= control target key end

     0   :  { %9 = vsyncpa [#allocation5], 0  ;;  %s248_s0 = inlined_call_operand.<no memory space> [shape: f32[1], index: 0, kind: input, shape index: {}]   ;;  %s249_s1 = inlined_call_operand.hbm [shape: f32[8,32], index: 1, kind: input, shape index: {}]   ;;  %s250_s2 = inlined_call_operand.hbm [shape: f32[32,128], index: 2, kind: input, shape index: {}]   ;;  %s251_s3 = inlined_call_operand.hbm [shape: f32[8,128], index: 3, kind: output, shape index: {}]  }
   0x1   :  { %10 = vsyncpa [#allocation8], 0 }
   0x2   :  { %11 = vsyncpa [#allocation6], 0  ;;  %s17_s14 = sshll.u32 %s249_s1, 4  ;;  %s210_s15 = smov [#allocation4]   ;;  %s18_s14 = int_to_ptr.hbm [resolvable:$true] %s17_s14 }
   0x3   :  { %s19_s16 = sshll.u32 %s210_s15, 4  ;;  %s27_s19 = sshll.u32 %s250_s2, 4  ;;  %s20_s16 = int_to_ptr.vmem [resolvable:$true] %s19_s16  ;;  %s28_s19 = int_to_ptr.hbm [resolvable:$true] %s27_s19 }
   0x4   :  { %22 = dma.hbm_to_vmem [thread:$0]  %s18_s14, 128, %s20_s16, [#allocation5]  }
   0x5   :  { %s211_s20 = smov [#allocation7]   ;;  %s212_s22 = smov 128  }
   0x6   :  { %s29_s21 = sshll.u32 %s211_s20, 4  ;;  %s213_s23 = smov 8   ;;  %s30_s21 = int_to_ptr.vmem [resolvable:$true] %s29_s21 }
   0x7   :  { %35 = dma.hbm_to_vmem [thread:$0]  %s28_s19, 512, %s30_s21, [#allocation8], %s212_s22, %s212_s22, %s213_s23  }
   0x8   :  { %204 = dma.done.wait [#allocation5], 128  }
   0x9   :  { %205 = vsyncadd [#allocation5], 4294967168 }
   0xa   :  { %206 = dma.done.wait [#allocation8], 512  }
   0xb   :  { %207 = vsyncadd [#allocation8], 4294966784  ;;  %v53_v0 = vld [vmem:[#allocation7 + $0x18] sm:$0xff]  ;;  %v58_v1 = vstv %s248_s0  ;;  %v52_v2 = vld [vmem:[#allocation7 + $0x10] sm:$0xff]  ;;  %v214_v9 = vmov 0.0   ;;  %vm77_vm4 = vcmask 261120  }
   0xc   :  { %v51_v3 = vld [vmem:[#allocation7 + $0x8] sm:$0xff]  ;;  %v57_v4 = vand.u32 2147483647, %v53_v0  ;;  %v56_v5 = vand.u32 2147483647, %v52_v2  ;;  %v50_v7 = vld [vmem:[#allocation7] sm:$0xff] }
   0xd   :  { %v55_v6 = vand.u32 2147483647, %v51_v3  ;;  %v54_v8 = vand.u32 2147483647, %v50_v7  ;;  %v76_v18 = vld [vmem:[#allocation4] sm:$0xff]  ;;  %s215_s0 = smov [#allocation9]  }
   0xe   :  { %vm62_vm0 = vcmp.gt.f32.partialorder %v57_v4, %v58_v1  ;;  %vm61_vm1 = vcmp.gt.f32.partialorder %v56_v5, %v58_v1  ;;  %s108_s2 = sshll.u32 %s215_s0, 4  ;;  %s110_s27 = sshll.u32 %s251_s3, 4  ;;  %s109_s2 = int_to_ptr.vmem [resolvable:$true] %s108_s2  ;;  %s111_s27 = int_to_ptr.hbm [resolvable:$true] %s110_s27 }
   0xf   :  { %vm60_vm2 = vcmp.gt.f32.partialorder %v55_v6, %v58_v1  ;;  %v124_v10 = vsel %vm62_vm0, 1.0, %v214_v9  ;;  %v123_v11 = vsel %vm61_vm1, 1.0, %v214_v9  ;;  %vm59_vm3 = vcmp.gt.f32.partialorder %v54_v8, %v58_v1 }
  0x10   :  { %v122_v12 = vsel %vm60_vm2, 1.0, %v214_v9  ;;  %v74_v13 = vmul.f32 %v124_v10, %v53_v0  ;;  %v73_v14 = vmul.f32 %v123_v11, %v52_v2  ;;  %v121_v15 = vsel %vm59_vm3, 1.0, %v214_v9 }
  0x11   :  { %v72_v16 = vmul.f32 %v122_v12, %v51_v3  ;;  %v71_v17 = vmul.f32 %v121_v15, %v50_v7 }
  0x12   :  { %93 = vmatpush.msra.mxu0 %v74_v13 }
  0x14   :  { %94 = vmatpush.msra.mxu0 %v73_v14 }
  0x16   :  { %95 = vmatpush.msra.mxu0 %v72_v16 }
  0x18   :  { %96 = vmatpush.msra.mxu0 %v71_v17 }
  0x19   :  { %125 = vmatmul.msk.f32.vlgmr.msra.gmra.mxu0 %vm77_vm4, %v76_v18 }
  0x96   :  { %v98_v19 = vpop.f32.mrf.mxu0 }
  0x97   :  { %102 = vst [vmem:[#allocation9] sm:$0xff] %v98_v19 }
  0x98   :  { %113 = dma.vmem_to_hbm [thread:$0]  %s109_s2, 128, %s111_s27, [#allocation6]  }
  0x99   :  { %208 = dma.done.wait [#allocation6], 128  }
  0x9a   :  { %209 = vsyncadd [#allocation6], 4294967168 }
  0x9b   :  { %118 = vsyncpa [#allocation5], 1 }
  0x9c   :  { %119 = vsyncpa [#allocation8], 1 }
  0x9d   :  { %120 = vsyncpa [#allocation6], 1 }

</bundles_post_ra>
